<compile_context>
chip_gen: v7x
topology: tpu7x:2x2x1
jax: 0.10.0
libtpu: 0.0.40
codegen_flags: <defaults>
</compile_context>

<pallas_src>
import math

import jax
import jax.numpy as jnp
from jax.experimental import pallas as pl
from jax.experimental.pallas import tpu as pltpu


def _round_up(a: int, b: int) -> int:
    return (a + b - 1) // b * b


# --------------------------------------------------------------------------- #
# Kernel body: one (tm, Dp) row tile of the fused gating forward.
# --------------------------------------------------------------------------- #
def gating_kernel(x_ref, y_ref, wy_ref, wx_ref, wu_ref, by_ref, o_ref):
    Dp = o_ref.shape[-1]  # padded feature width (lane dim, multiple of 128)

    x32 = x_ref[...].astype(jnp.float32)   # f32 copy for the elementwise gating
    xb = x_ref[...].astype(jnp.bfloat16)   # bf16 operands feed the MXU
    yb = y_ref[...].astype(jnp.bfloat16)

    # Two wide, independent matmuls (bf16 in, f32 accumulate):
    #   yy[:,   0:Dp ] = y @ Wr^T (+b_r)      xx[:,  0:Dp ] = x @ Ur^T
    #   yy[:, Dp:2Dp ] = y @ Wz^T (+b_z)      xx[:, Dp:2Dp] = x @ Uz^T
    #   yy[:,2Dp:3Dp ] = y @ Wg^T (+b_g)
    yy = jnp.dot(yb, wy_ref[...], preferred_element_type=jnp.float32) + by_ref[...]
    xx = jnp.dot(xb, wx_ref[...], preferred_element_type=jnp.float32)

    r = jax.nn.sigmoid(yy[:, 0:Dp] + xx[:, 0:Dp])
    z = jax.nn.sigmoid(yy[:, Dp:2 * Dp] + xx[:, Dp:2 * Dp])

    # Dependent matmul: (r * x) @ Ug^T.
    rx = (r * x32).astype(jnp.bfloat16)
    h = jnp.tanh(yy[:, 2 * Dp:3 * Dp]
                 + jnp.dot(rx, wu_ref[...], preferred_element_type=jnp.float32))

    g = (1.0 - z) * x32 + z * h
    o_ref[...] = g.astype(o_ref.dtype)


# --------------------------------------------------------------------------- #
# Host-side parameter packing (transpose, fold biases, pad, cast to bf16).
# --------------------------------------------------------------------------- #
def pack_params(params, *, bg=0.1, lane_multiple=128, weight_dtype=jnp.bfloat16):
    """params: [(Wr,br),(Ur,cr),(Wz,bz),(Uz,cz),(Wg,bgb),(Ug,cg)] in torch Linear
    convention (W: (d_out, d_in), b: (d_out,)).  Returns (W_y, W_x, W_u, b_y):
        W_y = [Wr^T | Wz^T | Wg^T]         (Dp, 3*Dp)  multiplies y
        W_x = [Ur^T | Uz^T]                (Dp, 2*Dp)  multiplies x
        W_u =  Ug^T                        (Dp,   Dp)  multiplies r*x
        b_y = [br+cr | bz+cz-bg | bgb+cg]  (1,  3*Dp)  float32
    with Dp = round_up(d_input, lane_multiple); weights cast to weight_dtype."""
    (wr, br), (ur, cr), (wz, bz), (uz, cz), (wg, bgb), (ug, cg) = params
    D = wr.shape[0]
    Dp = _round_up(D, lane_multiple)

    def pad_wt(w):  # torch (d_out, d_in) -> transposed + zero-padded (Dp, Dp)
        out = jnp.zeros((Dp, Dp), jnp.float32)
        return out.at[:D, :D].set(jnp.asarray(w, jnp.float32).T)

    w_y = jnp.concatenate([pad_wt(wr), pad_wt(wz), pad_wt(wg)], axis=1).astype(weight_dtype)
    w_x = jnp.concatenate([pad_wt(ur), pad_wt(uz)], axis=1).astype(weight_dtype)
    w_u = pad_wt(ug).astype(weight_dtype)

    def pad_b(b):
        out = jnp.zeros((Dp,), jnp.float32)
        return out.at[:D].set(jnp.asarray(b, jnp.float32).reshape(-1))

    b_y = jnp.concatenate([pad_b(br + cr), pad_b(bz + cz - bg), pad_b(bgb + cg)])
    return w_y, w_x, w_u, b_y.reshape(1, 3 * Dp)


# --------------------------------------------------------------------------- #
# Pallas wrapper.
# --------------------------------------------------------------------------- #
def gating_forward(x, y, packed, *, tm=512):
    """x, y: [..., d_input]; packed: output of pack_params()."""
    assert x.shape == y.shape, "x and y must have the same shape"
    w_y, w_x, w_u, b_y = packed
    Dp = w_u.shape[0]
    orig_shape = x.shape
    D = x.shape[-1]
    assert D <= Dp, "packed params were built for a smaller d_input"

    xf = x.reshape(-1, D)
    yf = y.reshape(-1, D)
    M = xf.shape[0]

    # Row tile: as large as requested, multiple of 8; pad M so the grid is exact.
    tm = _round_up(max(8, min(tm, M)), 8)
    Mp = _round_up(M, tm)
    if (Mp, Dp) != (M, D):
        xf = jnp.pad(xf, ((0, Mp - M), (0, Dp - D)))
        yf = jnp.pad(yf, ((0, Mp - M), (0, Dp - D)))

    row_spec = pl.BlockSpec((tm, Dp), lambda i: (i, 0))

    def build(const_pipeline_mode):
        extra = {} if const_pipeline_mode is None else {"pipeline_mode": const_pipeline_mode}
        const_spec = lambda a: pl.BlockSpec(a.shape, lambda i: (0, 0), **extra)
        return pl.pallas_call(
            gating_kernel,
            out_shape=jax.ShapeDtypeStruct((Mp, Dp), x.dtype),
            grid_spec=pltpu.PrefetchScalarGridSpec(
                num_scalar_prefetch=0,
                grid=(Mp // tm,),
                in_specs=[row_spec, row_spec,
                          const_spec(w_y), const_spec(w_x), const_spec(w_u),
                          const_spec(b_y)],
                out_specs=row_spec,
            ),
            compiler_params=pltpu.CompilerParams(
                dimension_semantics=("parallel",),
                # Above the default scoped limit (16 MiB v5e / 32 MiB v6e, v7x);
                # never exceeds physical VMEM (64 MiB on v7x).
                vmem_limit_bytes=64 * 1024 * 1024,
            ),
        )

    args = (xf, yf, w_y, w_x, w_u, b_y)
    try:
        # Weights/biases are grid-invariant -> single-buffer them (their index_map
        # is constant), freeing VMEM for larger row tiles (matters most on v7x).
        out = build(pl.Buffered(buffer_count=1))(*args)
    except Exception:
        # Fallback for Pallas builds without per-BlockSpec pipeline_mode control.
        out = build(None)(*args)

    return out[:M, :D].reshape(orig_shape)


# --------------------------------------------------------------------------- #
# Deterministic init + pure-JAX reference (matches the PyTorch module).
# --------------------------------------------------------------------------- #
def init_params(key, d_input):
    """Six Linear(d_input, d_input) layers in torch convention (W:(out,in), b:(out,)),
    order: Wr, Ur, Wz, Uz, Wg, Ug."""
    bound = 1.0 / math.sqrt(d_input)
    params = []
    for _ in range(6):
        key, kw, kb = jax.random.split(key, 3)
        w = jax.random.uniform(kw, (d_input, d_input), jnp.float32, -bound, bound)
        b = jax.random.uniform(kb, (d_input,), jnp.float32, -bound, bound)
        params.append((w, b))
    return params


def gating_reference(x, y, params, *, bg=0.1, matmul_dtype=jnp.float32):
    """Pure-JAX reference. matmul_dtype=jnp.bfloat16 mimics the kernel's MXU precision."""
    (wr, br), (ur, cr), (wz, bz), (uz, cz), (wg, bgb), (ug, cg) = params

    def lin(a, w, b):
        return jnp.dot(a.astype(matmul_dtype), w.T.astype(matmul_dtype),
                       preferred_element_type=jnp.float32) + b

    r = jax.nn.sigmoid(lin(y, wr, br) + lin(x, ur, cr))
    z = jax.nn.sigmoid(lin(y, wz, bz) + lin(x, uz, cz) - bg)
    h = jnp.tanh(lin(y, wg, bgb) + lin(r * x, ug, cg))
    return (1.0 - z) * x + z * h


if __name__ == "__main__":
    key = jax.random.PRNGKey(0)
    batch, seq, d_input = 2, 8, 32
    kx, ky, kp = jax.random.split(key, 3)
    x = jax.random.normal(kx, (batch, seq, d_input), jnp.float32)
    y = jax.random.normal(ky, (batch, seq, d_input), jnp.float32)

    params = init_params(kp, d_input)
    packed = pack_params(params, bg=0.1)

    out = gating_forward(x, y, packed)
    out = jax.block_until_ready(out)
    assert out.shape == x.shape

    # Plumbing check against a reference using the same bf16 MXU operands (tight tol).
    ref_bf16 = gating_reference(x, y, params, bg=0.1, matmul_dtype=jnp.bfloat16)
    assert jnp.allclose(out, ref_bf16, atol=1e-3, rtol=1e-3), "mismatch vs bf16-matmul reference"

    # Semantic check against the full-f32 reference (bf16 MXU operands -> ~1e-3 error).
    ref_f32 = gating_reference(x, y, params, bg=0.1, matmul_dtype=jnp.float32)
    assert jnp.allclose(out, ref_f32, atol=3e-2, rtol=3e-2), "mismatch vs f32 reference"

    print("KERNEL_OK")
</pallas_src>

<mosaic_0001>
module attributes {stable_mosaic.version = 11 : i64} {
  func.func @gating_kernel(%arg0: i32, %arg1: memref<16x128xf32, #tpu.memory_space<vmem>>, %arg2: memref<16x128xf32, #tpu.memory_space<vmem>>, %arg3: memref<128x384xbf16, #tpu.memory_space<vmem>>, %arg4: memref<128x256xbf16, #tpu.memory_space<vmem>>, %arg5: memref<128x128xbf16, #tpu.memory_space<vmem>>, %arg6: memref<1x384xf32, #tpu.memory_space<vmem>>, %arg7: memref<16x128xf32, #tpu.memory_space<vmem>>) attributes {dimension_semantics = [#tpu.dimension_semantics<parallel>], iteration_bounds = array<i64: 1>, scalar_prefetch = 0 : i64, scratch_operands = 0 : i64, tpu.core_type = #tpu.core_type<tc>, window_params = [{transform_indices = @transform_0, window_bounds = array<i64: 16, 128>}, {transform_indices = @transform_1, window_bounds = array<i64: 16, 128>}, {pipeline_mode = #tpu.pipeline_mode<synchronous>, transform_indices = @transform_2, window_bounds = array<i64: 128, 384>}, {pipeline_mode = #tpu.pipeline_mode<synchronous>, transform_indices = @transform_3, window_bounds = array<i64: 128, 256>}, {pipeline_mode = #tpu.pipeline_mode<synchronous>, transform_indices = @transform_4, window_bounds = array<i64: 128, 128>}, {pipeline_mode = #tpu.pipeline_mode<synchronous>, transform_indices = @transform_5, window_bounds = array<i64: 1, 384>}, {transform_indices = @transform_6, window_bounds = array<i64: 16, 128>}]} {
    %c0 = arith.constant 0 : index
    %c0_0 = arith.constant 0 : index
    %0 = vector.load %arg1[%c0, %c0_0] : memref<16x128xf32, #tpu.memory_space<vmem>>, vector<16x128xf32>
    %c0_1 = arith.constant 0 : index
    %c0_2 = arith.constant 0 : index
    %1 = vector.load %arg1[%c0_1, %c0_2] : memref<16x128xf32, #tpu.memory_space<vmem>>, vector<16x128xf32>
    %2 = arith.truncf %1 : vector<16x128xf32> to vector<16x128xbf16>
    %c0_3 = arith.constant 0 : index
    %c0_4 = arith.constant 0 : index
    %3 = vector.load %arg2[%c0_3, %c0_4] : memref<16x128xf32, #tpu.memory_space<vmem>>, vector<16x128xf32>
    %4 = arith.truncf %3 : vector<16x128xf32> to vector<16x128xbf16>
    %c0_5 = arith.constant 0 : index
    %c0_6 = arith.constant 0 : index
    %5 = vector.load %arg3[%c0_5, %c0_6] : memref<128x384xbf16, #tpu.memory_space<vmem>>, vector<128x384xbf16>
    %cst = arith.constant dense<0.000000e+00> : vector<16x384xf32>
    %6 = tpu.matmul %4, %5, %cst {dimension_numbers = #tpu.dot_dimension_numbers<[1], [0], [0], [1], [0, 0, 1, 1], [], []>} : vector<16x128xbf16>, vector<128x384xbf16>, vector<16x384xf32> -> vector<16x384xf32>
    %c0_7 = arith.constant 0 : index
    %c0_8 = arith.constant 0 : index
    %7 = vector.load %arg6[%c0_7, %c0_8] : memref<1x384xf32, #tpu.memory_space<vmem>>, vector<1x384xf32>
    %8 = vector.broadcast %7 : vector<1x384xf32> to vector<16x384xf32>
    %9 = arith.addf %6, %8 : vector<16x384xf32>
    %c0_9 = arith.constant 0 : index
    %c0_10 = arith.constant 0 : index
    %10 = vector.load %arg4[%c0_9, %c0_10] : memref<128x256xbf16, #tpu.memory_space<vmem>>, vector<128x256xbf16>
    %cst_11 = arith.constant dense<0.000000e+00> : vector<16x256xf32>
    %11 = tpu.matmul %2, %10, %cst_11 {dimension_numbers = #tpu.dot_dimension_numbers<[1], [0], [0], [1], [0, 0, 1, 1], [], []>} : vector<16x128xbf16>, vector<128x256xbf16>, vector<16x256xf32> -> vector<16x256xf32>
    %12 = vector.extract_strided_slice %9 {offsets = [0, 0], sizes = [16, 128], strides = [1, 1]} : vector<16x384xf32> to vector<16x128xf32>
    %13 = vector.extract_strided_slice %11 {offsets = [0, 0], sizes = [16, 128], strides = [1, 1]} : vector<16x256xf32> to vector<16x128xf32>
    %14 = arith.addf %12, %13 : vector<16x128xf32>
    %15 = arith.negf %14 : vector<16x128xf32>
    %16 = math.exp %15 : vector<16x128xf32>
    %cst_12 = arith.constant 1.000000e+00 : f32
    %17 = vector.broadcast %cst_12 : f32 to vector<16x128xf32>
    %18 = arith.addf %17, %16 : vector<16x128xf32>
    %19 = arith.divf %17, %18 : vector<16x128xf32>
    %20 = vector.extract_strided_slice %9 {offsets = [0, 128], sizes = [16, 128], strides = [1, 1]} : vector<16x384xf32> to vector<16x128xf32>
    %21 = vector.extract_strided_slice %11 {offsets = [0, 128], sizes = [16, 128], strides = [1, 1]} : vector<16x256xf32> to vector<16x128xf32>
    %22 = arith.addf %20, %21 : vector<16x128xf32>
    %23 = arith.negf %22 : vector<16x128xf32>
    %24 = math.exp %23 : vector<16x128xf32>
    %cst_13 = arith.constant 1.000000e+00 : f32
    %25 = vector.broadcast %cst_13 : f32 to vector<16x128xf32>
    %26 = arith.addf %25, %24 : vector<16x128xf32>
    %27 = arith.divf %25, %26 : vector<16x128xf32>
    %28 = arith.mulf %19, %0 : vector<16x128xf32>
    %29 = arith.truncf %28 : vector<16x128xf32> to vector<16x128xbf16>
    %30 = vector.extract_strided_slice %9 {offsets = [0, 256], sizes = [16, 128], strides = [1, 1]} : vector<16x384xf32> to vector<16x128xf32>
    %c0_14 = arith.constant 0 : index
    %c0_15 = arith.constant 0 : index
    %31 = vector.load %arg5[%c0_14, %c0_15] : memref<128x128xbf16, #tpu.memory_space<vmem>>, vector<128x128xbf16>
    %cst_16 = arith.constant dense<0.000000e+00> : vector<16x128xf32>
    %32 = tpu.matmul %29, %31, %cst_16 {dimension_numbers = #tpu.dot_dimension_numbers<[1], [0], [0], [1], [0, 0, 1, 1], [], []>} : vector<16x128xbf16>, vector<128x128xbf16>, vector<16x128xf32> -> vector<16x128xf32>
    %33 = arith.addf %30, %32 : vector<16x128xf32>
    %34 = math.tanh %33 : vector<16x128xf32>
    %cst_17 = arith.constant 1.000000e+00 : f32
    %35 = vector.broadcast %cst_17 : f32 to vector<16x128xf32>
    %36 = arith.subf %35, %27 : vector<16x128xf32>
    %37 = arith.mulf %36, %0 : vector<16x128xf32>
    %38 = arith.mulf %27, %34 : vector<16x128xf32>
    %39 = arith.addf %37, %38 : vector<16x128xf32>
    %c0_18 = arith.constant 0 : index
    %c0_19 = arith.constant 0 : index
    %40 = vector.load %arg7[%c0_18, %c0_19] : memref<16x128xf32, #tpu.memory_space<vmem>>, vector<16x128xf32>
    tpu.vector_store %arg7[%c0_18, %c0_19], %39 {strides = array<i32>} : memref<16x128xf32, #tpu.memory_space<vmem>>, vector<16x128xf32>,
    return
  }
  func.func @transform_0(%arg0: i32) -> (i32, i32) {
    %c0_i32 = arith.constant 0 : i32
    %c0_i32_0 = arith.constant 0 : i32
    return %arg0, %c0_i32 : i32, i32
  }
  func.func @transform_1(%arg0: i32) -> (i32, i32) {
    %c0_i32 = arith.constant 0 : i32
    %c0_i32_0 = arith.constant 0 : i32
    return %arg0, %c0_i32 : i32, i32
  }
  func.func @transform_2(%arg0: i32) -> (i32, i32) {
    %c0_i32 = arith.constant 0 : i32
    %c0_i32_0 = arith.constant 0 : i32
    %c0_i32_1 = arith.constant 0 : i32
    return %c0_i32, %c0_i32_0 : i32, i32
  }
  func.func @transform_3(%arg0: i32) -> (i32, i32) {
    %c0_i32 = arith.constant 0 : i32
    %c0_i32_0 = arith.constant 0 : i32
    %c0_i32_1 = arith.constant 0 : i32
    return %c0_i32, %c0_i32_0 : i32, i32
  }
  func.func @transform_4(%arg0: i32) -> (i32, i32) {
    %c0_i32 = arith.constant 0 : i32
    %c0_i32_0 = arith.constant 0 : i32
    %c0_i32_1 = arith.constant 0 : i32
    return %c0_i32, %c0_i32_0 : i32, i32
  }
  func.func @transform_5(%arg0: i32) -> (i32, i32) {
    %c0_i32 = arith.constant 0 : i32
    %c0_i32_0 = arith.constant 0 : i32
    %c0_i32_1 = arith.constant 0 : i32
    return %c0_i32, %c0_i32_0 : i32, i32
  }
  func.func @transform_6(%arg0: i32) -> (i32, i32) {
    %c0_i32 = arith.constant 0 : i32
    %c0_i32_0 = arith.constant 0 : i32
    return %arg0, %c0_i32 : i32, i32
  }
}

module attributes {stable_mosaic.version = 11 : i64} {
  func.func @gating_kernel(%arg0: i32, %arg1: memref<16x128xf32, #tpu.memory_space<vmem>>, %arg2: memref<16x128xf32, #tpu.memory_space<vmem>>, %arg3: memref<128x384xbf16, #tpu.memory_space<vmem>>, %arg4: memref<128x256xbf16, #tpu.memory_space<vmem>>, %arg5: memref<128x128xbf16, #tpu.memory_space<vmem>>, %arg6: memref<1x384xf32, #tpu.memory_space<vmem>>, %arg7: memref<16x128xf32, #tpu.memory_space<vmem>>) attributes {dimension_semantics = [#tpu.dimension_semantics<parallel>], iteration_bounds = array<i64: 1>, scalar_prefetch = 0 : i64, scratch_operands = 0 : i64, tpu.core_type = #tpu.core_type<tc>, window_params = [{transform_indices = @transform_0, window_bounds = array<i64: 16, 128>}, {transform_indices = @transform_1, window_bounds = array<i64: 16, 128>}, {pipeline_mode = #tpu.pipeline_mode<synchronous>, transform_indices = @transform_2, window_bounds = array<i64: 128, 384>}, {pipeline_mode = #tpu.pipeline_mode<synchronous>, transform_indices = @transform_3, window_bounds = array<i64: 128, 256>}, {pipeline_mode = #tpu.pipeline_mode<synchronous>, transform_indices = @transform_4, window_bounds = array<i64: 128, 128>}, {pipeline_mode = #tpu.pipeline_mode<synchronous>, transform_indices = @transform_5, window_bounds = array<i64: 1, 384>}, {transform_indices = @transform_6, window_bounds = array<i64: 16, 128>}]} {
    %c0 = arith.constant 0 : index
    %c0_0 = arith.constant 0 : index
    %0 = vector.load %arg1[%c0, %c0_0] : memref<16x128xf32, #tpu.memory_space<vmem>>, vector<16x128xf32>
    %c0_1 = arith.constant 0 : index
    %c0_2 = arith.constant 0 : index
    %1 = vector.load %arg1[%c0_1, %c0_2] : memref<16x128xf32, #tpu.memory_space<vmem>>, vector<16x128xf32>
    %2 = arith.truncf %1 : vector<16x128xf32> to vector<16x128xbf16>
    %c0_3 = arith.constant 0 : index
    %c0_4 = arith.constant 0 : index
    %3 = vector.load %arg2[%c0_3, %c0_4] : memref<16x128xf32, #tpu.memory_space<vmem>>, vector<16x128xf32>
    %4 = arith.truncf %3 : vector<16x128xf32> to vector<16x128xbf16>
    %c0_5 = arith.constant 0 : index
    %c0_6 = arith.constant 0 : index
    %5 = vector.load %arg3[%c0_5, %c0_6] : memref<128x384xbf16, #tpu.memory_space<vmem>>, vector<128x384xbf16>
    %cst = arith.constant dense<0.000000e+00> : vector<16x384xf32>
    %6 = tpu.matmul %4, %5, %cst {dimension_numbers = #tpu.dot_dimension_numbers<[1], [0], [0], [1], [0, 0, 1, 1], [], []>} : vector<16x128xbf16>, vector<128x384xbf16>, vector<16x384xf32> -> vector<16x384xf32>
    %c0_7 = arith.constant 0 : index
    %c0_8 = arith.constant 0 : index
    %7 = vector.load %arg6[%c0_7, %c0_8] : memref<1x384xf32, #tpu.memory_space<vmem>>, vector<1x384xf32>
    %8 = vector.broadcast %7 : vector<1x384xf32> to vector<16x384xf32>
    %9 = arith.addf %6, %8 : vector<16x384xf32>
    %c0_9 = arith.constant 0 : index
    %c0_10 = arith.constant 0 : index
    %10 = vector.load %arg4[%c0_9, %c0_10] : memref<128x256xbf16, #tpu.memory_space<vmem>>, vector<128x256xbf16>
    %cst_11 = arith.constant dense<0.000000e+00> : vector<16x256xf32>
    %11 = tpu.matmul %2, %10, %cst_11 {dimension_numbers = #tpu.dot_dimension_numbers<[1], [0], [0], [1], [0, 0, 1, 1], [], []>} : vector<16x128xbf16>, vector<128x256xbf16>, vector<16x256xf32> -> vector<16x256xf32>
    %12 = vector.extract_strided_slice %9 {offsets = [0, 0], sizes = [16, 128], strides = [1, 1]} : vector<16x384xf32> to vector<16x128xf32>
    %13 = vector.extract_strided_slice %11 {offsets = [0, 0], sizes = [16, 128], strides = [1, 1]} : vector<16x256xf32> to vector<16x128xf32>
    %14 = arith.addf %12, %13 : vector<16x128xf32>
    %15 = arith.negf %14 : vector<16x128xf32>
    %16 = math.exp %15 : vector<16x128xf32>
    %cst_12 = arith.constant 1.000000e+00 : f32
    %17 = vector.broadcast %cst_12 : f32 to vector<16x128xf32>
    %18 = arith.addf %17, %16 : vector<16x128xf32>
    %19 = arith.divf %17, %18 : vector<16x128xf32>
    %20 = vector.extract_strided_slice %9 {offsets = [0, 128], sizes = [16, 128], strides = [1, 1]} : vector<16x384xf32> to vector<16x128xf32>
    %21 = vector.extract_strided_slice %11 {offsets = [0, 128], sizes = [16, 128], strides = [1, 1]} : vector<16x256xf32> to vector<16x128xf32>
    %22 = arith.addf %20, %21 : vector<16x128xf32>
    %23 = arith.negf %22 : vector<16x128xf32>
    %24 = math.exp %23 : vector<16x128xf32>
    %cst_13 = arith.constant 1.000000e+00 : f32
    %25 = vector.broadcast %cst_13 : f32 to vector<16x128xf32>
    %26 = arith.addf %25, %24 : vector<16x128xf32>
    %27 = arith.divf %25, %26 : vector<16x128xf32>
    %28 = arith.mulf %19, %0 : vector<16x128xf32>
    %29 = arith.truncf %28 : vector<16x128xf32> to vector<16x128xbf16>
    %30 = vector.extract_strided_slice %9 {offsets = [0, 256], sizes = [16, 128], strides = [1, 1]} : vector<16x384xf32> to vector<16x128xf32>
    %c0_14 = arith.constant 0 : index
    %c0_15 = arith.constant 0 : index
    %31 = vector.load %arg5[%c0_14, %c0_15] : memref<128x128xbf16, #tpu.memory_space<vmem>>, vector<128x128xbf16>
    %cst_16 = arith.constant dense<0.000000e+00> : vector<16x128xf32>
    %32 = tpu.matmul %29, %31, %cst_16 {dimension_numbers = #tpu.dot_dimension_numbers<[1], [0], [0], [1], [0, 0, 1, 1], [], []>} : vector<16x128xbf16>, vector<128x128xbf16>, vector<16x128xf32> -> vector<16x128xf32>
    %33 = arith.addf %30, %32 : vector<16x128xf32>
    %34 = math.tanh %33 : vector<16x128xf32>
    %cst_17 = arith.constant 1.000000e+00 : f32
    %35 = vector.broadcast %cst_17 : f32 to vector<16x128xf32>
    %36 = arith.subf %35, %27 : vector<16x128xf32>
    %37 = arith.mulf %36, %0 : vector<16x128xf32>
    %38 = arith.mulf %27, %34 : vector<16x128xf32>
    %39 = arith.addf %37, %38 : vector<16x128xf32>
    %c0_18 = arith.constant 0 : index
    %c0_19 = arith.constant 0 : index
    %40 = vector.load %arg7[%c0_18, %c0_19] : memref<16x128xf32, #tpu.memory_space<vmem>>, vector<16x128xf32>
    tpu.vector_store %arg7[%c0_18, %c0_19], %39 {strides = array<i32>} : memref<16x128xf32, #tpu.memory_space<vmem>>, vector<16x128xf32>,
    return
  }
  func.func @transform_0(%arg0: i32) -> (i32, i32) {
    %c0_i32 = arith.constant 0 : i32
    %c0_i32_0 = arith.constant 0 : i32
    return %arg0, %c0_i32 : i32, i32
  }
  func.func @transform_1(%arg0: i32) -> (i32, i32) {
    %c0_i32 = arith.constant 0 : i32
    %c0_i32_0 = arith.constant 0 : i32
    return %arg0, %c0_i32 : i32, i32
  }
  func.func @transform_2(%arg0: i32) -> (i32, i32) {
    %c0_i32 = arith.constant 0 : i32
    %c0_i32_0 = arith.constant 0 : i32
    %c0_i32_1 = arith.constant 0 : i32
    return %c0_i32, %c0_i32_0 : i32, i32
  }
  func.func @transform_3(%arg0: i32) -> (i32, i32) {
    %c0_i32 = arith.constant 0 : i32
    %c0_i32_0 = arith.constant 0 : i32
    %c0_i32_1 = arith.constant 0 : i32
    return %c0_i32, %c0_i32_0 : i32, i32
  }
  func.func @transform_4(%arg0: i32) -> (i32, i32) {
    %c0_i32 = arith.constant 0 : i32
    %c0_i32_0 = arith.constant 0 : i32
    %c0_i32_1 = arith.constant 0 : i32
    return %c0_i32, %c0_i32_0 : i32, i32
  }
  func.func @transform_5(%arg0: i32) -> (i32, i32) {
    %c0_i32 = arith.constant 0 : i32
    %c0_i32_0 = arith.constant 0 : i32
    %c0_i32_1 = arith.constant 0 : i32
    return %c0_i32, %c0_i32_0 : i32, i32
  }
  func.func @transform_6(%arg0: i32) -> (i32, i32) {
    %c0_i32 = arith.constant 0 : i32
    %c0_i32_0 = arith.constant 0 : i32
    return %arg0, %c0_i32 : i32, i32
  }
}

</mosaic_0001>

<bundles_post_ra>
// kernel: tpu_custom_call.1
= control target key start
LH: loop header
LB: loop body
LE: loop exit
PB: predicated region body
PF: predicated region fallthrough
CT: control target
= control target key end

     0   :  { %11 = vsyncpa [#allocation3], 0  ;;  %s1258_s0 = inlined_call_operand.hbm [shape: f32[16,128], index: 0, kind: input, shape index: {}]   ;;  %s1259_s1 = inlined_call_operand.hbm [shape: f32[16,128], index: 1, kind: input, shape index: {}]   ;;  %s1260_s2 = inlined_call_operand.hbm [shape: bf16[128,384], index: 2, kind: input, shape index: {}]   ;;  %s1261_s3 = inlined_call_operand.hbm [shape: bf16[128,256], index: 3, kind: input, shape index: {}]   ;;  %s1262_s4 = inlined_call_operand.hbm [shape: bf16[128,128], index: 4, kind: input, shape index: {}]   ;;  %s1263_s5 = inlined_call_operand.hbm [shape: f32[1,384], index: 5, kind: input, shape index: {}]   ;;  %s1264_s6 = inlined_call_operand.hbm [shape: f32[16,128], index: 6, kind: output, shape index: {}]  }
   0x1   :  { %12 = vsyncpa [#allocation6], 0 }
   0x2   :  { %13 = vsyncpa [#allocation9], 0 }
   0x3   :  { %14 = vsyncpa [#allocation12], 0 }
   0x4   :  { %15 = vsyncpa [#allocation4], 0  ;;  %s1069_s21 = smov [#allocation5]   ;;  %s1070_s23 = smov [#allocation8]  }
   0x5   :  { %s33_s22 = sshll.u32 %s1069_s21, 4  ;;  %s57_s24 = sshll.u32 %s1070_s23, 4  ;;  %s34_s22 = int_to_ptr.vmem [resolvable:$true] %s33_s22  ;;  %s1120_s24 = int_to_ptr.vmem [resolvable:$true] %s57_s24 }
   0x6   :  { %s905_s27 = scalar_lea.hbm %s1259_s1, 256 }
   0x7   :  { %p906_p0 = scmp.ne.s32.totalorder %s1259_s1, %s905_s27  ;;  %p909_p1 = scmp.lt.u32.totalorder %s905_s27, %s1259_s1 }
   0x9   :  { %p911_p2 = pnand %p909_p1, %p906_p0 }
   0xb   :  { %914 = shalt.err (!%p911_p2)
}
   0xc   :  { %s915_s8 = scalar_lea.vmem %s34_s22, 256  ;;  %p920_p4 = scmp.lt.s32.totalorder %s34_s22, %s34_s22 }
   0xd   :  { %p916_p3 = scmp.ne.s32.totalorder %s34_s22, %s915_s8  ;;  %p921_p5 = scmp.lt.s32.totalorder %s915_s8, %s915_s8 }
   0xf   :  { %p922_p6 = por %p921_p5, %p920_p4 }
  0x11   :  { %p923_p7 = pnand %p922_p6, %p916_p3 }
  0x13   :  { %926 = shalt.err (!%p923_p7)
}
  0x14   :  { %s1071_s9 = smov 128   ;;  %s1072_s10 = smov 8  }
  0x15   :  { %39 = dma.hbm_to_vmem [thread:$0]  %s1259_s1, 256, %s34_s22, [#allocation6], %s1071_s9, %s1071_s9, %s1072_s10  }
  0x16   :  { %s927_s15 = scalar_lea.hbm %s1261_s3, 2048 }
  0x17   :  { %p928_p8 = scmp.ne.s32.totalorder %s1261_s3, %s927_s15  ;;  %p931_p9 = scmp.lt.u32.totalorder %s927_s15, %s1261_s3 }
  0x19   :  { %p933_p10 = pnand %p931_p9, %p928_p8 }
  0x1b   :  { %936 = shalt.err (!%p933_p10)
}
  0x1c   :  { %s937_s20 = scalar_lea.vmem %s1120_s24, 2048  ;;  %p942_p12 = scmp.lt.s32.totalorder %s1120_s24, %s1120_s24 }
  0x1d   :  { %p938_p11 = scmp.ne.s32.totalorder %s1120_s24, %s937_s20  ;;  %p943_p13 = scmp.lt.s32.totalorder %s937_s20, %s937_s20 }
  0x1f   :  { %p944_p0 = por %p943_p13, %p942_p12 }
  0x21   :  { %p945_p1 = pnand %p944_p0, %p938_p11 }
  0x23   :  { %948 = shalt.err (!%p945_p1)
}
  0x24   :  { %63 = dma.hbm_to_vmem [thread:$0]  %s1261_s3, 2048, %s1120_s24, [#allocation9], %s1071_s9, %s1071_s9, %s1072_s10  }
  0x25   :  { %s1073_s22 = smov [#allocation2]   ;;  %s1074_s25 = smov [#allocation7]  }
  0x26   :  { %s21_s23 = sshll.u32 %s1073_s22, 4  ;;  %s45_s26 = sshll.u32 %s1074_s25, 4  ;;  %s22_s23 = int_to_ptr.vmem [resolvable:$true] %s21_s23  ;;  %s1157_s26 = int_to_ptr.vmem [resolvable:$true] %s45_s26 }
  0x27   :  { %s949_s29 = scalar_lea.hbm %s1258_s0, 256 }
  0x28   :  { %p950_p2 = scmp.ne.s32.totalorder %s1258_s0, %s949_s29  ;;  %p953_p3 = scmp.lt.u32.totalorder %s949_s29, %s1258_s0 }
  0x2a   :  { %p955_p4 = pnand %p953_p3, %p950_p2 }
  0x2c   :  { %958 = shalt.err (!%p955_p4)
}
  0x2d   :  { %s959_s3 = scalar_lea.vmem %s22_s23, 256  ;;  %p964_p6 = scmp.lt.s32.totalorder %s22_s23, %s22_s23 }
  0x2e   :  { %p960_p5 = scmp.ne.s32.totalorder %s22_s23, %s959_s3  ;;  %p965_p7 = scmp.lt.s32.totalorder %s959_s3, %s959_s3 }
  0x30   :  { %p966_p8 = por %p965_p7, %p964_p6 }
  0x32   :  { %p967_p9 = pnand %p966_p8, %p960_p5 }
  0x34   :  { %970 = shalt.err (!%p967_p9)
}
  0x35   :  { %27 = dma.hbm_to_vmem [thread:$0]  %s1258_s0, 256, %s22_s23, [#allocation3], %s1071_s9, %s1071_s9, %s1072_s10  }
  0x36   :  { %s971_s15 = scalar_lea.hbm %s1260_s2, 3072 }
  0x37   :  { %p972_p10 = scmp.ne.s32.totalorder %s1260_s2, %s971_s15  ;;  %p975_p11 = scmp.lt.u32.totalorder %s971_s15, %s1260_s2 }
  0x39   :  { %p977_p12 = pnand %p975_p11, %p972_p10 }
  0x3b   :  { %980 = shalt.err (!%p977_p12)
}
  0x3c   :  { %s981_s20 = scalar_lea.vmem %s1157_s26, 3072  ;;  %p986_p0 = scmp.lt.s32.totalorder %s1157_s26, %s1157_s26 }
  0x3d   :  { %p982_p13 = scmp.ne.s32.totalorder %s1157_s26, %s981_s20  ;;  %p987_p1 = scmp.lt.s32.totalorder %s981_s20, %s981_s20 }
  0x3f   :  { %p988_p2 = por %p987_p1, %p986_p0 }
  0x41   :  { %p989_p3 = pnand %p988_p2, %p982_p13 }
  0x43   :  { %992 = shalt.err (!%p989_p3)
}
  0x44   :  { %s1075_s0 = smov 192   ;;  %s1076_s1 = smov 12  }
  0x45   :  { %51 = dma.hbm_to_vmem [thread:$0]  %s1260_s2, 3072, %s1157_s26, [#allocation6], %s1075_s0, %s1075_s0, %s1076_s1  }
  0x46   :  { %s1077_s23 = smov [#allocation10]   ;;  %s993_s29 = scalar_lea.hbm %s1262_s4, 1024 }
  0x47   :  { %s69_s25 = sshll.u32 %s1077_s23, 4  ;;  %p994_p4 = scmp.ne.s32.totalorder %s1262_s4, %s993_s29  ;;  %s70_s25 = int_to_ptr.vmem [resolvable:$true] %s69_s25 }
  0x48   :  { %p997_p5 = scmp.lt.u32.totalorder %s993_s29, %s1262_s4 }
  0x4a   :  { %p999_p6 = pnand %p997_p5, %p994_p4 }
  0x4c   :  { %1002 = shalt.err (!%p999_p6)
}
  0x4d   :  { %s1003_s3 = scalar_lea.vmem %s70_s25, 1024  ;;  %p1008_p8 = scmp.lt.s32.totalorder %s70_s25, %s70_s25 }
  0x4e   :  { %p1004_p7 = scmp.ne.s32.totalorder %s70_s25, %s1003_s3  ;;  %p1009_p9 = scmp.lt.s32.totalorder %s1003_s3, %s1003_s3 }
  0x50   :  { %p1010_p10 = por %p1009_p9, %p1008_p8 }
  0x52   :  { %p1011_p11 = pnand %p1010_p10, %p1004_p7 }
  0x54   :  { %1014 = shalt.err (!%p1011_p11)
}
  0x55   :  { %s1078_s2 = smov 64   ;;  %s1079_s26 = smov 4  }
  0x56   :  { %75 = dma.hbm_to_vmem [thread:$0]  %s1262_s4, 1024, %s70_s25, [#allocation9], %s1078_s2, %s1078_s2, %s1079_s26  }
  0x57   :  { %s1080_s13 = smov [#allocation11]   ;;  %s1015_s17 = scalar_lea.hbm %s1263_s5, 48 }
  0x58   :  { %s82_s14 = sshll.u32 %s1080_s13, 4  ;;  %p1016_p12 = scmp.ne.s32.totalorder %s1263_s5, %s1015_s17  ;;  %s83_s14 = int_to_ptr.vmem [resolvable:$true] %s82_s14 }
  0x59   :  { %p1019_p13 = scmp.lt.u32.totalorder %s1015_s17, %s1263_s5 }
  0x5b   :  { %p1021_p0 = pnand %p1019_p13, %p1016_p12 }
  0x5d   :  { %1024 = shalt.err (!%p1021_p0)
}
  0x5e   :  { %s1025_s1 = scalar_lea.vmem %s83_s14, 48  ;;  %s1029_s4 = scalar_lea.vmem %s83_s14, 64 }
  0x5f   :  { %p1026_p1 = scmp.ne.s32.totalorder %s83_s14, %s1025_s1  ;;  %p1030_p2 = scmp.lt.s32.totalorder %s83_s14, %s83_s14 }
  0x60   :  { %p1031_p3 = scmp.lt.s32.totalorder %s1029_s4, %s1025_s1 }
  0x62   :  { %p1032_p4 = por %p1031_p3, %p1030_p2 }
  0x64   :  { %p1033_p5 = pnand %p1032_p4, %p1026_p1 }
  0x66   :  { %1036 = shalt.err (!%p1033_p5)
}
  0x67   :  { %85 = dma.hbm_to_vmem [thread:$0]  %s1263_s5, 48, %s83_s14, [#allocation12]  }
  0x68   :  { %1059 = dma.done.wait [#allocation3], 256  }
  0x69   :  { %1060 = vsyncadd [#allocation3], 4294967040 }
  0x6a   :  { %1061 = dma.done.wait [#allocation6], 3328  }
  0x6b   :  { %1062 = vsyncadd [#allocation6], 4294963968 }
  0x6c   :  { %1063 = dma.done.wait [#allocation9], 3072  }
  0x6d   :  { %1064 = vsyncadd [#allocation9], 4294964224 }
  0x6e   :  { %1065 = dma.done.wait [#allocation12], 48  }
  0x6f   :  { %1066 = vsyncadd [#allocation12], 4294967248  ;;  %v1081_v0 = vmov 0   ;;  %v1082_v1 = vmov 0.0   ;;  %v821_v2 = vld [vmem:[#allocation7 + $0x4] ss:$12 sps:$4 sm:$0xff]   ;;  %v145_v56 = vlaneseq }
  0x70   :  { %320 = vmatprep.mubr.bf16.mxu0 %v1081_v0  ;;  %751 = vmatprep.subr.bf16.mxu1 %v1082_v1  ;;  %v823_v3 = vld [vmem:[#allocation7] ss:$12 sps:$4 sm:$0xff]   ;;  %v824_v4 = vld [vmem:[#allocation7 + $0x1c] ss:$12 sps:$4 sm:$0xff]   ;;  %v826_v5 = vld [vmem:[#allocation7 + $0x18] ss:$12 sps:$4 sm:$0xff]  }
  0x71   :  { %288 = vmatprep.subr.bf16.mxu0 %v821_v2  ;;  %v827_v6 = vld [vmem:[#allocation7 + $0x34] ss:$12 sps:$4 sm:$0xff]   ;;  %v829_v7 = vld [vmem:[#allocation7 + $0x30] ss:$12 sps:$4 sm:$0xff]   ;;  %v830_v8 = vld [vmem:[#allocation7 + $0x4c] ss:$12 sps:$4 sm:$0xff]  }
  0x72   :  { %289 = vmatpush1.bf16.msra.mxu0 %v823_v3  ;;  %v832_v9 = vld [vmem:[#allocation7 + $0x48] ss:$12 sps:$4 sm:$0xff]   ;;  %v833_v10 = vld [vmem:[#allocation7 + $0x64] ss:$12 sps:$4 sm:$0xff]   ;;  %v835_v11 = vld [vmem:[#allocation7 + $0x60] ss:$12 sps:$4 sm:$0xff]  }
  0x73   :  { %290 = vmatprep.subr.bf16.mxu0 %v824_v4  ;;  %v836_v12 = vld [vmem:[#allocation7 + $0x7c] ss:$12 sps:$4 sm:$0xff]   ;;  %v838_v13 = vld [vmem:[#allocation7 + $0x78] ss:$12 sps:$4 sm:$0xff]   ;;  %v839_v14 = vld [vmem:[#allocation7 + $0x94] ss:$12 sps:$4 sm:$0xff]  }
  0x74   :  { %v841_v15 = vld [vmem:[#allocation7 + $0x90] ss:$12 sps:$4 sm:$0xff]   ;;  %v869_v16 = vld [vmem:[#allocation7 + $0x8] ss:$12 sps:$4 sm:$0xff]   ;;  %v842_v17 = vld [vmem:[#allocation7 + $0xac] ss:$12 sps:$4 sm:$0xff]  }
  0x75   :  { %v844_v18 = vld [vmem:[#allocation7 + $0xa8] ss:$12 sps:$4 sm:$0xff]   ;;  %752 = vmatpush3.bf16.msra.mxu1 %v869_v16  ;;  %v870_v19 = vld [vmem:[#allocation7 + $0x20] ss:$12 sps:$4 sm:$0xff]   ;;  %v109_v21 = vld [vmem:[#allocation5 + $0x8] sm:$0xff]  ;;  %vm1083_vm0 = vmmov 0  }
  0x76   :  { %291 = vmatpush1.bf16.msra.mxu0 %v826_v5  ;;  %v108_v20 = vld [vmem:[#allocation5] sm:$0xff]  ;;  %753 = vmatprep.subr.bf16.mxu1 %v1082_v1  ;;  %v847_v22 = vld [vmem:[#allocation8 + $0x4] ss:$8 sps:$4 sm:$0xff]   ;;  %v845_v24 = vld [vmem:[#allocation8] ss:$8 sps:$4 sm:$0xff]   ;;  %v146_v57 = vshrl.u32 %v145_v56, 7 }
  0x77   :  { %292 = vmatprep.subr.bf16.mxu0 %v827_v6  ;;  %v871_v23 = vld [vmem:[#allocation7 + $0x38] ss:$12 sps:$4 sm:$0xff]   ;;  %v110_v25 = vpack.c.bf16 %v109_v21, %v108_v20  ;;  %v850_v26 = vld [vmem:[#allocation8 + $0x14] ss:$8 sps:$4 sm:$0xff]   ;;  %v851_v31 = vld [vmem:[#allocation8 + $0x20] ss:$8 sps:$4 sm:$0xff]   ;;  %767 = vmatprep.mubr.msk.bf16.mxu1 %vm1083_vm0, %v1082_v1 }
  0x78   :  { %v872_v27 = vld [vmem:[#allocation7 + $0x50] ss:$12 sps:$4 sm:$0xff]   ;;  %v853_v29 = vld [vmem:[#allocation8 + $0x24] ss:$8 sps:$4 sm:$0xff]   ;;  %v873_v30 = vld [vmem:[#allocation7 + $0x68] ss:$12 sps:$4 sm:$0xff]  }
  0x79   :  { %754 = vmatpush3.bf16.msra.mxu1 %v870_v19  ;;  %v848_v28 = vld [vmem:[#allocation8 + $0x10] ss:$8 sps:$4 sm:$0xff]   ;;  %v856_v32 = vld [vmem:[#allocation8 + $0x34] ss:$8 sps:$4 sm:$0xff]   ;;  %v874_v33 = vld [vmem:[#allocation7 + $0x80] ss:$12 sps:$4 sm:$0xff]  }
  0x7a   :  { %293 = vmatpush1.bf16.msra.mxu0 %v829_v7  ;;  %755 = vmatprep.subr.bf16.mxu1 %v1082_v1  ;;  %v854_v34 = vld [vmem:[#allocation8 + $0x30] ss:$8 sps:$4 sm:$0xff]   ;;  %v859_v35 = vld [vmem:[#allocation8 + $0x44] ss:$8 sps:$4 sm:$0xff]   ;;  %v857_v37 = vld [vmem:[#allocation8 + $0x40] ss:$8 sps:$4 sm:$0xff]  }
  0x7b   :  { %294 = vmatprep.subr.bf16.mxu0 %v830_v8  ;;  %v875_v36 = vld [vmem:[#allocation7 + $0x98] ss:$12 sps:$4 sm:$0xff]   ;;  %v862_v38 = vld [vmem:[#allocation8 + $0x54] ss:$8 sps:$4 sm:$0xff]   ;;  %v863_v42 = vld [vmem:[#allocation8 + $0x60] ss:$8 sps:$4 sm:$0xff]  }
  0x7c   :  { %v876_v39 = vld [vmem:[#allocation7 + $0xb0] ss:$12 sps:$4 sm:$0xff]   ;;  %v865_v41 = vld [vmem:[#allocation8 + $0x64] ss:$8 sps:$4 sm:$0xff]   ;;  %v147_v58 = vsub.s32 0, %v146_v57  ;;  %s1084_s5 = smov [#allocation13]  }
  0x7d   :  { %756 = vmatpush3.bf16.msra.mxu1 %v871_v23  ;;  %v860_v40 = vld [vmem:[#allocation8 + $0x50] ss:$8 sps:$4 sm:$0xff]   ;;  %v868_v43 = vld [vmem:[#allocation8 + $0x74] ss:$8 sps:$4 sm:$0xff]   ;;  %v1224_v45 = vld [vmem:[#allocation2] sm:$0xff]  ;;  %v155_v23 = vsub.s32 2, %v146_v57 }
  0x7e   :  { %295 = vmatpush1.bf16.msra.mxu0 %v832_v9  ;;  %757 = vmatprep.subr.bf16.mxu1 %v1082_v1  ;;  %v866_v44 = vld [vmem:[#allocation8 + $0x70] ss:$8 sps:$4 sm:$0xff]   ;;  %v1226_v46 = vld [vmem:[#allocation2 + $0x8] sm:$0xff]  ;;  %v877_v48 = vld [vmem:[#allocation10] sm:$0xff]   ;;  %s666_s23 = sshll.u32 %s1084_s5, 4  ;;  %s667_s23 = int_to_ptr.vmem [resolvable:$true] %s666_s23 }
  0x7f   :  { %296 = vmatprep.subr.bf16.mxu0 %v833_v10  ;;  %v107_v47 = vpack.c.bf16 %v1226_v46, %v1224_v45  ;;  %v878_v49 = vld [vmem:[#allocation10 + $0x8] sm:$0xff]   ;;  %v879_v50 = vld [vmem:[#allocation10 + $0x10] sm:$0xff]   ;;  %v880_v51 = vld [vmem:[#allocation10 + $0x18] sm:$0xff]   ;;  %s1037_s25 = scalar_lea.vmem %s667_s23, 256  ;;  %p1042_p7 = scmp.lt.s32.totalorder %s667_s23, %s667_s23 }
  0x80   :  { %v881_v52 = vld [vmem:[#allocation10 + $0x20] sm:$0xff]   ;;  %v882_v53 = vld [vmem:[#allocation10 + $0x28] sm:$0xff]   ;;  %v883_v54 = vld [vmem:[#allocation10 + $0x30] sm:$0xff]   ;;  %p1038_p6 = scmp.ne.s32.totalorder %s667_s23, %s1037_s25  ;;  %p1043_p8 = scmp.lt.s32.totalorder %s1037_s25, %s1037_s25 }
  0x81   :  { %758 = vmatpush3.bf16.msra.mxu1 %v872_v27  ;;  %v884_v55 = vld [vmem:[#allocation10 + $0x38] sm:$0xff]   ;;  %v143_v59 = vld [vmem:[#allocation11] sm:$0x7] }
  0x82   :  { %297 = vmatpush1.bf16.msra.mxu0 %v835_v11  ;;  %759 = vmatprep.subr.bf16.mxu1 %v1082_v1  ;;  %v148_v60 = vrot.slane %v143_v59, %v147_v58  ;;  %p1044_p9 = por %p1043_p8, %p1042_p7 }
  0x83   :  { %298 = vmatprep.subr.bf16.mxu0 %v836_v12 }
  0x84   :  { %p1045_p10 = pnand %p1044_p9, %p1038_p6 }
  0x85   :  { %760 = vmatpush3.bf16.msra.mxu1 %v873_v30 }
  0x86   :  { %299 = vmatpush1.bf16.msra.mxu0 %v838_v13  ;;  %761 = vmatprep.subr.bf16.mxu1 %v1082_v1 }
  0x87   :  { %300 = vmatprep.subr.bf16.mxu0 %v839_v14  ;;  %v151_v14 = vsub.s32 1, %v146_v57 }
  0x89   :  { %762 = vmatpush3.bf16.msra.mxu1 %v874_v33 }
  0x8a   :  { %301 = vmatpush1.bf16.msra.mxu0 %v841_v15  ;;  %763 = vmatprep.subr.bf16.mxu1 %v1082_v1  ;;  %v152_v15 = vrot.slane %v143_v59, %v151_v14 }
  0x8b   :  { %302 = vmatprep.subr.bf16.mxu0 %v842_v17 }
  0x8d   :  { %764 = vmatpush3.bf16.msra.mxu1 %v875_v36 }
  0x8e   :  { %303 = vmatpush1.bf16.msra.mxu0 %v844_v18  ;;  %765 = vmatprep.subr.bf16.mxu1 %v1082_v1 }
  0x8f   :  { %468 = vmatprep.subr.bf16.mxu0 %v847_v22 }
  0x91   :  { %321 = vmatmul.mubr.bf16.vlgmr.msra.gmra.mrb[0].mxu0 %v110_v25  ;;  %766 = vmatpush3.bf16.msra.mxu1 %v876_v39 }
  0x92   :  { %469 = vmatpush1.bf16.msra.mxu0 %v845_v24  ;;  %500 = vmatprep.mubr.bf16.mxu0 %v1081_v0 }
  0x93   :  { %470 = vmatprep.subr.bf16.mxu0 %v850_v26  ;;  %771 = vmatprep.subr.bf16.mxu1 %v1082_v1 }
  0x94   :  { %768 = vmatmul.mubr.bf16.vlgmr.msra.gmra.mrb[0].mxu1 %v110_v25  ;;  %v156_v25 = vrot.slane %v143_v59, %v155_v23 }
  0x95   :  { %772 = vmatpush3.bf16.msra.mxu1 %v877_v48  ;;  %787 = vmatprep.mubr.msk.bf16.mxu1 %vm1083_vm0, %v1082_v1 }
  0x96   :  { %471 = vmatpush1.bf16.msra.mxu0 %v848_v28  ;;  %773 = vmatprep.subr.bf16.mxu1 %v1082_v1 }
  0x97   :  { %472 = vmatprep.subr.bf16.mxu0 %v853_v29 }
  0x99   :  { %774 = vmatpush3.bf16.msra.mxu1 %v878_v49 }
  0x9a   :  { %473 = vmatpush1.bf16.msra.mxu0 %v851_v31  ;;  %775 = vmatprep.subr.bf16.mxu1 %v1082_v1 }
  0x9b   :  { %474 = vmatprep.subr.bf16.mxu0 %v856_v32 }
  0x9d   :  { %776 = vmatpush3.bf16.msra.mxu1 %v879_v50 }
  0x9e   :  { %475 = vmatpush1.bf16.msra.mxu0 %v854_v34  ;;  %777 = vmatprep.subr.bf16.mxu1 %v1082_v1 }
  0x9f   :  { %476 = vmatprep.subr.bf16.mxu0 %v859_v35 }
  0xa1   :  { %778 = vmatpush3.bf16.msra.mxu1 %v880_v51 }
  0xa2   :  { %477 = vmatpush1.bf16.msra.mxu0 %v857_v37  ;;  %779 = vmatprep.subr.bf16.mxu1 %v1082_v1 }
  0xa3   :  { %478 = vmatprep.subr.bf16.mxu0 %v862_v38 }
  0xa5   :  { %780 = vmatpush3.bf16.msra.mxu1 %v881_v52 }
  0xa6   :  { %479 = vmatpush1.bf16.msra.mxu0 %v860_v40  ;;  %781 = vmatprep.subr.bf16.mxu1 %v1082_v1 }
  0xa7   :  { %480 = vmatprep.subr.bf16.mxu0 %v865_v41 }
  0xa9   :  { %782 = vmatpush3.bf16.msra.mxu1 %v882_v53 }
  0xaa   :  { %481 = vmatpush1.bf16.msra.mxu0 %v863_v42  ;;  %783 = vmatprep.subr.bf16.mxu1 %v1082_v1 }
  0xab   :  { %482 = vmatprep.subr.bf16.mxu0 %v868_v43 }
  0xad   :  { %784 = vmatpush3.bf16.msra.mxu1 %v883_v54 }
  0xae   :  { %483 = vmatpush1.bf16.msra.mxu0 %v866_v44  ;;  %785 = vmatprep.subr.bf16.mxu1 %v1082_v1 }
  0xb1   :  { %501 = vmatmul.mubr.bf16.vlgmr.msra.gmra.mrb[0].mxu0 %v107_v47  ;;  %786 = vmatpush3.bf16.msra.mxu1 %v884_v55 }
 0x184   :  { %v502_v61 = vpop.f32.mrb[0].mxu0 }
 0x185   :  { %v791_v62 = vadd.f32 %v502_v61, %v148_v60  ;;  %v504_v63 = vpop.f32.mrb[1].mxu0 }
 0x186   :  { %v506_v0 = vpop.f32.mrb[2].mxu0  ;;  %v792_v16 = vadd.f32 %v504_v63, %v152_v15 }
 0x187   :  { %v721_v2 = vmul.f32 -1.442695, %v791_v62  ;;  %v793_v3 = vadd.f32 %v506_v0, %v148_v60  ;;  %v508_v4 = vpop.f32.mrb[3].mxu0 }
 0x188   :  { %v794_v17 = vadd.f32 %v508_v4, %v152_v15  ;;  %v723_v18 = vmul.f32 -1.442695, %v792_v16 }
 0x189   :  { %885 = vpow2.f32 %v721_v2  ;;  %v722_v5 = vmul.f32 -1.442695, %v793_v3 }
 0x18a   :  { %v724_v19 = vmul.f32 -1.442695, %v794_v17 }
 0x18b   :  { %887 = vpow2.f32 %v722_v5 }
 0x193   :  { %v886_v6 = vpop.eup %885 }
 0x194   :  { %v519_v7 = vadd.f32 1.0, %v886_v6 }
 0x195   :  { %v888_v8 = vpop.eup %887 }
 0x196   :  { %889 = vrcp.f32 %v519_v7  ;;  %v520_v1 = vadd.f32 1.0, %v888_v8 }
 0x198   :  { %891 = vrcp.f32 %v520_v1 }
 0x199   :  { %893 = vpow2.f32 %v723_v18 }
 0x19a   :  { %895 = vpow2.f32 %v724_v19 }
 0x1a0   :  { %v890_v9 = vpop.eup %889 }
 0x1a1   :  { %v539_v11 = vmul.f32 %v890_v9, %v1224_v45 }
 0x1a2   :  { %v892_v10 = vpop.eup %891 }
 0x1a3   :  { %v540_v12 = vmul.f32 %v892_v10, %v1226_v46  ;;  %v894_v20 = vpop.eup %893 }
 0x1a4   :  { %v896_v21 = vpop.eup %895  ;;  %v533_v22 = vadd.f32 1.0, %v894_v20 }
 0x1a5   :  { %v541_v13 = vpack.c.bf16 %v540_v12, %v539_v11  ;;  %v534_v24 = vadd.f32 1.0, %v896_v21 }
 0x1a6   :  { %897 = vrcp.f32 %v533_v22 }
 0x1a7   :  { %788 = vmatmul.mubr.bf16.vlgmr.msra.gmra.mrb[0].mxu1 %v541_v13  ;;  %899 = vrcp.f32 %v534_v24 }
 0x1b0   :  { %v898_v32 = vpop.eup %897 }
 0x1b1   :  { %v900_v33 = vpop.eup %899  ;;  %v651_v34 = vsub.f32 1.0, %v898_v32 }
 0x1b2   :  { %v652_v35 = vsub.f32 1.0, %v900_v33 }
 0x1b3   :  { %v653_v37 = vmul.f32 %v651_v34, %v1224_v45 }
 0x1b4   :  { %v654_v40 = vmul.f32 %v652_v35, %v1226_v46 }
 0x27a   :  { %v640_v26 = vpop.f32.mrb[0].mxu1 }
 0x27b   :  { %v795_v27 = vadd.f32 %v640_v26, %v156_v25  ;;  %v789_v28 = vpop.f32.mrb[1].mxu1 }
 0x27c   :  { %v643_v29 = vpop.f32.mrb[2].mxu1 }
 0x27d   :  { %901 = vtanh.f32 %v795_v27  ;;  %v796_v30 = vadd.f32 %v643_v29, %v156_v25  ;;  %v790_v31 = vpop.f32.mrb[3].mxu1 }
 0x27f   :  { %903 = vtanh.f32 %v796_v30 }
 0x287   :  { %v902_v36 = vpop.eup %901 }
 0x288   :  { %v655_v38 = vmul.f32 %v902_v36, %v898_v32 }
 0x289   :  { %v904_v39 = vpop.eup %903 }
 0x28a   :  { %v656_v41 = vmul.f32 %v904_v39, %v900_v33  ;;  %v657_v42 = vadd.f32 %v655_v38, %v653_v37 }
 0x28c   :  { %v658_v43 = vadd.f32 %v656_v41, %v654_v40  ;;  %659 = vst [vmem:[#allocation13] sm:$0xff] %v657_v42 }
 0x28e   :  { %660 = vst [vmem:[#allocation13 + $0x8] sm:$0xff] %v658_v43 }
 0x28f   :  { %1048 = shalt.err (!%p1045_p10)
}
 0x290   :  { %s1049_s29 = scalar_lea.hbm %s1264_s6, 256 }
 0x291   :  { %p1050_p11 = scmp.ne.s32.totalorder %s1264_s6, %s1049_s29  ;;  %p1053_p12 = scmp.lt.u32.totalorder %s1049_s29, %s1264_s6 }
 0x293   :  { %p1055_p13 = pnand %p1053_p12, %p1050_p11 }
 0x295   :  { %1058 = shalt.err (!%p1055_p13)
}
 0x296   :  { %672 = dma.vmem_to_hbm [thread:$0]  %s667_s23, 256, %s1264_s6, [#allocation4], %s1071_s9, %s1071_s9, %s1072_s10  }
 0x297   :  { %1067 = dma.done.wait [#allocation4], 256  }
 0x298   :  { %1068 = vsyncadd [#allocation4], 4294967040 }
 0x299   :  { %676 = vsyncpa [#allocation3], 1 }
 0x29a   :  { %677 = vsyncpa [#allocation6], 1 }
 0x29b   :  { %678 = vsyncpa [#allocation9], 1 }
 0x29c   :  { %679 = vsyncpa [#allocation12], 1 }
 0x29d   :  { %680 = vsyncpa [#allocation4], 1 }

// kernel: tpu_custom_call.1
= control target key start
LH: loop header
LB: loop body
LE: loop exit
PB: predicated region body
PF: predicated region fallthrough
CT: control target
= control target key end

     0   :  { %11 = vsyncpa [#allocation3], 0  ;;  %s1258_s0 = inlined_call_operand.hbm [shape: f32[16,128], index: 0, kind: input, shape index: {}]   ;;  %s1259_s1 = inlined_call_operand.hbm [shape: f32[16,128], index: 1, kind: input, shape index: {}]   ;;  %s1260_s2 = inlined_call_operand.hbm [shape: bf16[128,384], index: 2, kind: input, shape index: {}]   ;;  %s1261_s3 = inlined_call_operand.hbm [shape: bf16[128,256], index: 3, kind: input, shape index: {}]   ;;  %s1262_s4 = inlined_call_operand.hbm [shape: bf16[128,128], index: 4, kind: input, shape index: {}]   ;;  %s1263_s5 = inlined_call_operand.hbm [shape: f32[1,384], index: 5, kind: input, shape index: {}]   ;;  %s1264_s6 = inlined_call_operand.hbm [shape: f32[16,128], index: 6, kind: output, shape index: {}]  }
   0x1   :  { %12 = vsyncpa [#allocation6], 0 }
   0x2   :  { %13 = vsyncpa [#allocation9], 0 }
   0x3   :  { %14 = vsyncpa [#allocation12], 0 }
   0x4   :  { %15 = vsyncpa [#allocation4], 0  ;;  %s1069_s21 = smov [#allocation5]   ;;  %s1070_s23 = smov [#allocation8]  }
   0x5   :  { %s33_s22 = sshll.u32 %s1069_s21, 4  ;;  %s57_s24 = sshll.u32 %s1070_s23, 4  ;;  %s34_s22 = int_to_ptr.vmem [resolvable:$true] %s33_s22  ;;  %s1120_s24 = int_to_ptr.vmem [resolvable:$true] %s57_s24 }
   0x6   :  { %s905_s27 = scalar_lea.hbm %s1259_s1, 256 }
   0x7   :  { %p906_p0 = scmp.ne.s32.totalorder %s1259_s1, %s905_s27  ;;  %p909_p1 = scmp.lt.u32.totalorder %s905_s27, %s1259_s1 }
   0x9   :  { %p911_p2 = pnand %p909_p1, %p906_p0 }
   0xb   :  { %914 = shalt.err (!%p911_p2)
}
   0xc   :  { %s915_s8 = scalar_lea.vmem %s34_s22, 256  ;;  %p920_p4 = scmp.lt.s32.totalorder %s34_s22, %s34_s22 }
   0xd   :  { %p916_p3 = scmp.ne.s32.totalorder %s34_s22, %s915_s8  ;;  %p921_p5 = scmp.lt.s32.totalorder %s915_s8, %s915_s8 }
   0xf   :  { %p922_p6 = por %p921_p5, %p920_p4 }
  0x11   :  { %p923_p7 = pnand %p922_p6, %p916_p3 }
  0x13   :  { %926 = shalt.err (!%p923_p7)
}
  0x14   :  { %s1071_s9 = smov 128   ;;  %s1072_s10 = smov 8  }
  0x15   :  { %39 = dma.hbm_to_vmem [thread:$0]  %s1259_s1, 256, %s34_s22, [#allocation6], %s1071_s9, %s1071_s9, %s1072_s10  }
  0x16   :  { %s927_s15 = scalar_lea.hbm %s1261_s3, 2048 }
  0x17   :  { %p928_p8 = scmp.ne.s32.totalorder %s1261_s3, %s927_s15  ;;  %p931_p9 = scmp.lt.u32.totalorder %s927_s15, %s1261_s3 }
  0x19   :  { %p933_p10 = pnand %p931_p9, %p928_p8 }
  0x1b   :  { %936 = shalt.err (!%p933_p10)
}
  0x1c   :  { %s937_s20 = scalar_lea.vmem %s1120_s24, 2048  ;;  %p942_p12 = scmp.lt.s32.totalorder %s1120_s24, %s1120_s24 }
  0x1d   :  { %p938_p11 = scmp.ne.s32.totalorder %s1120_s24, %s937_s20  ;;  %p943_p13 = scmp.lt.s32.totalorder %s937_s20, %s937_s20 }
  0x1f   :  { %p944_p0 = por %p943_p13, %p942_p12 }
  0x21   :  { %p945_p1 = pnand %p944_p0, %p938_p11 }
  0x23   :  { %948 = shalt.err (!%p945_p1)
}
  0x24   :  { %63 = dma.hbm_to_vmem [thread:$0]  %s1261_s3, 2048, %s1120_s24, [#allocation9], %s1071_s9, %s1071_s9, %s1072_s10  }
  0x25   :  { %s1073_s22 = smov [#allocation2]   ;;  %s1074_s25 = smov [#allocation7]  }
  0x26   :  { %s21_s23 = sshll.u32 %s1073_s22, 4  ;;  %s45_s26 = sshll.u32 %s1074_s25, 4  ;;  %s22_s23 = int_to_ptr.vmem [resolvable:$true] %s21_s23  ;;  %s1157_s26 = int_to_ptr.vmem [resolvable:$true] %s45_s26 }
  0x27   :  { %s949_s29 = scalar_lea.hbm %s1258_s0, 256 }
  0x28   :  { %p950_p2 = scmp.ne.s32.totalorder %s1258_s0, %s949_s29  ;;  %p953_p3 = scmp.lt.u32.totalorder %s949_s29, %s1258_s0 }
  0x2a   :  { %p955_p4 = pnand %p953_p3, %p950_p2 }
  0x2c   :  { %958 = shalt.err (!%p955_p4)
}
  0x2d   :  { %s959_s3 = scalar_lea.vmem %s22_s23, 256  ;;  %p964_p6 = scmp.lt.s32.totalorder %s22_s23, %s22_s23 }
  0x2e   :  { %p960_p5 = scmp.ne.s32.totalorder %s22_s23, %s959_s3  ;;  %p965_p7 = scmp.lt.s32.totalorder %s959_s3, %s959_s3 }
  0x30   :  { %p966_p8 = por %p965_p7, %p964_p6 }
  0x32   :  { %p967_p9 = pnand %p966_p8, %p960_p5 }
  0x34   :  { %970 = shalt.err (!%p967_p9)
}
  0x35   :  { %27 = dma.hbm_to_vmem [thread:$0]  %s1258_s0, 256, %s22_s23, [#allocation3], %s1071_s9, %s1071_s9, %s1072_s10  }
  0x36   :  { %s971_s15 = scalar_lea.hbm %s1260_s2, 3072 }
  0x37   :  { %p972_p10 = scmp.ne.s32.totalorder %s1260_s2, %s971_s15  ;;  %p975_p11 = scmp.lt.u32.totalorder %s971_s15, %s1260_s2 }
  0x39   :  { %p977_p12 = pnand %p975_p11, %p972_p10 }
  0x3b   :  { %980 = shalt.err (!%p977_p12)
}
  0x3c   :  { %s981_s20 = scalar_lea.vmem %s1157_s26, 3072  ;;  %p986_p0 = scmp.lt.s32.totalorder %s1157_s26, %s1157_s26 }
  0x3d   :  { %p982_p13 = scmp.ne.s32.totalorder %s1157_s26, %s981_s20  ;;  %p987_p1 = scmp.lt.s32.totalorder %s981_s20, %s981_s20 }
  0x3f   :  { %p988_p2 = por %p987_p1, %p986_p0 }
  0x41   :  { %p989_p3 = pnand %p988_p2, %p982_p13 }
  0x43   :  { %992 = shalt.err (!%p989_p3)
}
  0x44   :  { %s1075_s0 = smov 192   ;;  %s1076_s1 = smov 12  }
  0x45   :  { %51 = dma.hbm_to_vmem [thread:$0]  %s1260_s2, 3072, %s1157_s26, [#allocation6], %s1075_s0, %s1075_s0, %s1076_s1  }
  0x46   :  { %s1077_s23 = smov [#allocation10]   ;;  %s993_s29 = scalar_lea.hbm %s1262_s4, 1024 }
  0x47   :  { %s69_s25 = sshll.u32 %s1077_s23, 4  ;;  %p994_p4 = scmp.ne.s32.totalorder %s1262_s4, %s993_s29  ;;  %s70_s25 = int_to_ptr.vmem [resolvable:$true] %s69_s25 }
  0x48   :  { %p997_p5 = scmp.lt.u32.totalorder %s993_s29, %s1262_s4 }
  0x4a   :  { %p999_p6 = pnand %p997_p5, %p994_p4 }
  0x4c   :  { %1002 = shalt.err (!%p999_p6)
}
  0x4d   :  { %s1003_s3 = scalar_lea.vmem %s70_s25, 1024  ;;  %p1008_p8 = scmp.lt.s32.totalorder %s70_s25, %s70_s25 }
  0x4e   :  { %p1004_p7 = scmp.ne.s32.totalorder %s70_s25, %s1003_s3  ;;  %p1009_p9 = scmp.lt.s32.totalorder %s1003_s3, %s1003_s3 }
  0x50   :  { %p1010_p10 = por %p1009_p9, %p1008_p8 }
  0x52   :  { %p1011_p11 = pnand %p1010_p10, %p1004_p7 }
  0x54   :  { %1014 = shalt.err (!%p1011_p11)
}
  0x55   :  { %s1078_s2 = smov 64   ;;  %s1079_s26 = smov 4  }
  0x56   :  { %75 = dma.hbm_to_vmem [thread:$0]  %s1262_s4, 1024, %s70_s25, [#allocation9], %s1078_s2, %s1078_s2, %s1079_s26  }
  0x57   :  { %s1080_s13 = smov [#allocation11]   ;;  %s1015_s17 = scalar_lea.hbm %s1263_s5, 48 }
  0x58   :  { %s82_s14 = sshll.u32 %s1080_s13, 4  ;;  %p1016_p12 = scmp.ne.s32.totalorder %s1263_s5, %s1015_s17  ;;  %s83_s14 = int_to_ptr.vmem [resolvable:$true] %s82_s14 }
  0x59   :  { %p1019_p13 = scmp.lt.u32.totalorder %s1015_s17, %s1263_s5 }
  0x5b   :  { %p1021_p0 = pnand %p1019_p13, %p1016_p12 }
  0x5d   :  { %1024 = shalt.err (!%p1021_p0)
}
  0x5e   :  { %s1025_s1 = scalar_lea.vmem %s83_s14, 48  ;;  %s1029_s4 = scalar_lea.vmem %s83_s14, 64 }
  0x5f   :  { %p1026_p1 = scmp.ne.s32.totalorder %s83_s14, %s1025_s1  ;;  %p1030_p2 = scmp.lt.s32.totalorder %s83_s14, %s83_s14 }
  0x60   :  { %p1031_p3 = scmp.lt.s32.totalorder %s1029_s4, %s1025_s1 }
  0x62   :  { %p1032_p4 = por %p1031_p3, %p1030_p2 }
  0x64   :  { %p1033_p5 = pnand %p1032_p4, %p1026_p1 }
  0x66   :  { %1036 = shalt.err (!%p1033_p5)
}
  0x67   :  { %85 = dma.hbm_to_vmem [thread:$0]  %s1263_s5, 48, %s83_s14, [#allocation12]  }
  0x68   :  { %1059 = dma.done.wait [#allocation3], 256  }
  0x69   :  { %1060 = vsyncadd [#allocation3], 4294967040 }
  0x6a   :  { %1061 = dma.done.wait [#allocation6], 3328  }
  0x6b   :  { %1062 = vsyncadd [#allocation6], 4294963968 }
  0x6c   :  { %1063 = dma.done.wait [#allocation9], 3072  }
  0x6d   :  { %1064 = vsyncadd [#allocation9], 4294964224 }
  0x6e   :  { %1065 = dma.done.wait [#allocation12], 48  }
  0x6f   :  { %1066 = vsyncadd [#allocation12], 4294967248  ;;  %v1081_v0 = vmov 0   ;;  %v1082_v1 = vmov 0.0   ;;  %v821_v2 = vld [vmem:[#allocation7 + $0x4] ss:$12 sps:$4 sm:$0xff]   ;;  %v145_v56 = vlaneseq }
  0x70   :  { %320 = vmatprep.mubr.bf16.mxu0 %v1081_v0  ;;  %751 = vmatprep.subr.bf16.mxu1 %v1082_v1  ;;  %v823_v3 = vld [vmem:[#allocation7] ss:$12 sps:$4 sm:$0xff]   ;;  %v824_v4 = vld [vmem:[#allocation7 + $0x1c] ss:$12 sps:$4 sm:$0xff]   ;;  %v826_v5 = vld [vmem:[#allocation7 + $0x18] ss:$12 sps:$4 sm:$0xff]  }
  0x71   :  { %288 = vmatprep.subr.bf16.mxu0 %v821_v2  ;;  %v827_v6 = vld [vmem:[#allocation7 + $0x34] ss:$12 sps:$4 sm:$0xff]   ;;  %v829_v7 = vld [vmem:[#allocation7 + $0x30] ss:$12 sps:$4 sm:$0xff]   ;;  %v830_v8 = vld [vmem:[#allocation7 + $0x4c] ss:$12 sps:$4 sm:$0xff]  }
  0x72   :  { %289 = vmatpush1.bf16.msra.mxu0 %v823_v3  ;;  %v832_v9 = vld [vmem:[#allocation7 + $0x48] ss:$12 sps:$4 sm:$0xff]   ;;  %v833_v10 = vld [vmem:[#allocation7 + $0x64] ss:$12 sps:$4 sm:$0xff]   ;;  %v835_v11 = vld [vmem:[#allocation7 + $0x60] ss:$12 sps:$4 sm:$0xff]  }
  0x73   :  { %290 = vmatprep.subr.bf16.mxu0 %v824_v4  ;;  %v836_v12 = vld [vmem:[#allocation7 + $0x7c] ss:$12 sps:$4 sm:$0xff]   ;;  %v838_v13 = vld [vmem:[#allocation7 + $0x78] ss:$12 sps:$4 sm:$0xff]   ;;  %v839_v14 = vld [vmem:[#allocation7 + $0x94] ss:$12 sps:$4 sm:$0xff]  }
  0x74   :  { %v841_v15 = vld [vmem:[#allocation7 + $0x90] ss:$12 sps:$4 sm:$0xff]   ;;  %v869_v16 = vld [vmem:[#allocation7 + $0x8] ss:$12 sps:$4 sm:$0xff]   ;;  %v842_v17 = vld [vmem:[#allocation7 + $0xac] ss:$12 sps:$4 sm:$0xff]  }
  0x75   :  { %v844_v18 = vld [vmem:[#allocation7 + $0xa8] ss:$12 sps:$4 sm:$0xff]   ;;  %752 = vmatpush3.bf16.msra.mxu1 %v869_v16  ;;  %v870_v19 = vld [vmem:[#allocation7 + $0x20] ss:$12 sps:$4 sm:$0xff]   ;;  %v109_v21 = vld [vmem:[#allocation5 + $0x8] sm:$0xff]  ;;  %vm1083_vm0 = vmmov 0  }
  0x76   :  { %291 = vmatpush1.bf16.msra.mxu0 %v826_v5  ;;  %v108_v20 = vld [vmem:[#allocation5] sm:$0xff]  ;;  %753 = vmatprep.subr.bf16.mxu1 %v1082_v1  ;;  %v847_v22 = vld [vmem:[#allocation8 + $0x4] ss:$8 sps:$4 sm:$0xff]   ;;  %v845_v24 = vld [vmem:[#allocation8] ss:$8 sps:$4 sm:$0xff]   ;;  %v146_v57 = vshrl.u32 %v145_v56, 7 }
  0x77   :  { %292 = vmatprep.subr.bf16.mxu0 %v827_v6  ;;  %v871_v23 = vld [vmem:[#allocation7 + $0x38] ss:$12 sps:$4 sm:$0xff]   ;;  %v110_v25 = vpack.c.bf16 %v109_v21, %v108_v20  ;;  %v850_v26 = vld [vmem:[#allocation8 + $0x14] ss:$8 sps:$4 sm:$0xff]   ;;  %v851_v31 = vld [vmem:[#allocation8 + $0x20] ss:$8 sps:$4 sm:$0xff]   ;;  %767 = vmatprep.mubr.msk.bf16.mxu1 %vm1083_vm0, %v1082_v1 }
  0x78   :  { %v872_v27 = vld [vmem:[#allocation7 + $0x50] ss:$12 sps:$4 sm:$0xff]   ;;  %v853_v29 = vld [vmem:[#allocation8 + $0x24] ss:$8 sps:$4 sm:$0xff]   ;;  %v873_v30 = vld [vmem:[#allocation7 + $0x68] ss:$12 sps:$4 sm:$0xff]  }
  0x79   :  { %754 = vmatpush3.bf16.msra.mxu1 %v870_v19  ;;  %v848_v28 = vld [vmem:[#allocation8 + $0x10] ss:$8 sps:$4 sm:$0xff]   ;;  %v856_v32 = vld [vmem:[#allocation8 + $0x34] ss:$8 sps:$4 sm:$0xff]   ;;  %v874_v33 = vld [vmem:[#allocation7 + $0x80] ss:$12 sps:$4 sm:$0xff]  }
  0x7a   :  { %293 = vmatpush1.bf16.msra.mxu0 %v829_v7  ;;  %755 = vmatprep.subr.bf16.mxu1 %v1082_v1  ;;  %v854_v34 = vld [vmem:[#allocation8 + $0x30] ss:$8 sps:$4 sm:$0xff]   ;;  %v859_v35 = vld [vmem:[#allocation8 + $0x44] ss:$8 sps:$4 sm:$0xff]   ;;  %v857_v37 = vld [vmem:[#allocation8 + $0x40] ss:$8 sps:$4 sm:$0xff]  }
  0x7b   :  { %294 = vmatprep.subr.bf16.mxu0 %v830_v8  ;;  %v875_v36 = vld [vmem:[#allocation7 + $0x98] ss:$12 sps:$4 sm:$0xff]   ;;  %v862_v38 = vld [vmem:[#allocation8 + $0x54] ss:$8 sps:$4 sm:$0xff]   ;;  %v863_v42 = vld [vmem:[#allocation8 + $0x60] ss:$8 sps:$4 sm:$0xff]  }
  0x7c   :  { %v876_v39 = vld [vmem:[#allocation7 + $0xb0] ss:$12 sps:$4 sm:$0xff]   ;;  %v865_v41 = vld [vmem:[#allocation8 + $0x64] ss:$8 sps:$4 sm:$0xff]   ;;  %v147_v58 = vsub.s32 0, %v146_v57  ;;  %s1084_s5 = smov [#allocation13]  }
  0x7d   :  { %756 = vmatpush3.bf16.msra.mxu1 %v871_v23  ;;  %v860_v40 = vld [vmem:[#allocation8 + $0x50] ss:$8 sps:$4 sm:$0xff]   ;;  %v868_v43 = vld [vmem:[#allocation8 + $0x74] ss:$8 sps:$4 sm:$0xff]   ;;  %v1224_v45 = vld [vmem:[#allocation2] sm:$0xff]  ;;  %v155_v23 = vsub.s32 2, %v146_v57 }
  0x7e   :  { %295 = vmatpush1.bf16.msra.mxu0 %v832_v9  ;;  %757 = vmatprep.subr.bf16.mxu1 %v1082_v1  ;;  %v866_v44 = vld [vmem:[#allocation8 + $0x70] ss:$8 sps:$4 sm:$0xff]   ;;  %v1226_v46 = vld [vmem:[#allocation2 + $0x8] sm:$0xff]  ;;  %v877_v48 = vld [vmem:[#allocation10] sm:$0xff]   ;;  %s666_s23 = sshll.u32 %s1084_s5, 4  ;;  %s667_s23 = int_to_ptr.vmem [resolvable:$true] %s666_s23 }
  0x7f   :  { %296 = vmatprep.subr.bf16.mxu0 %v833_v10  ;;  %v107_v47 = vpack.c.bf16 %v1226_v46, %v1224_v45  ;;  %v878_v49 = vld [vmem:[#allocation10 + $0x8] sm:$0xff]   ;;  %v879_v50 = vld [vmem:[#allocation10 + $0x10] sm:$0xff]   ;;  %v880_v51 = vld [vmem:[#allocation10 + $0x18] sm:$0xff]   ;;  %s1037_s25 = scalar_lea.vmem %s667_s23, 256  ;;  %p1042_p7 = scmp.lt.s32.totalorder %s667_s23, %s667_s23 }
  0x80   :  { %v881_v52 = vld [vmem:[#allocation10 + $0x20] sm:$0xff]   ;;  %v882_v53 = vld [vmem:[#allocation10 + $0x28] sm:$0xff]   ;;  %v883_v54 = vld [vmem:[#allocation10 + $0x30] sm:$0xff]   ;;  %p1038_p6 = scmp.ne.s32.totalorder %s667_s23, %s1037_s25  ;;  %p1043_p8 = scmp.lt.s32.totalorder %s1037_s25, %s1037_s25 }
  0x81   :  { %758 = vmatpush3.bf16.msra.mxu1 %v872_v27  ;;  %v884_v55 = vld [vmem:[#allocation10 + $0x38] sm:$0xff]   ;;  %v143_v59 = vld [vmem:[#allocation11] sm:$0x7] }
  0x82   :  { %297 = vmatpush1.bf16.msra.mxu0 %v835_v11  ;;  %759 = vmatprep.subr.bf16.mxu1 %v1082_v1  ;;  %v148_v60 = vrot.slane %v143_v59, %v147_v58  ;;  %p1044_p9 = por %p1043_p8, %p1042_p7 }
  0x83   :  { %298 = vmatprep.subr.bf16.mxu0 %v836_v12 }
  0x84   :  { %p1045_p10 = pnand %p1044_p9, %p1038_p6 }
  0x85   :  { %760 = vmatpush3.bf16.msra.mxu1 %v873_v30 }
  0x86   :  { %299 = vmatpush1.bf16.msra.mxu0 %v838_v13  ;;  %761 = vmatprep.subr.bf16.mxu1 %v1082_v1 }
  0x87   :  { %300 = vmatprep.subr.bf16.mxu0 %v839_v14  ;;  %v151_v14 = vsub.s32 1, %v146_v57 }
  0x89   :  { %762 = vmatpush3.bf16.msra.mxu1 %v874_v33 }
  0x8a   :  { %301 = vmatpush1.bf16.msra.mxu0 %v841_v15  ;;  %763 = vmatprep.subr.bf16.mxu1 %v1082_v1  ;;  %v152_v15 = vrot.slane %v143_v59, %v151_v14 }
  0x8b   :  { %302 = vmatprep.subr.bf16.mxu0 %v842_v17 }
  0x8d   :  { %764 = vmatpush3.bf16.msra.mxu1 %v875_v36 }
  0x8e   :  { %303 = vmatpush1.bf16.msra.mxu0 %v844_v18  ;;  %765 = vmatprep.subr.bf16.mxu1 %v1082_v1 }
  0x8f   :  { %468 = vmatprep.subr.bf16.mxu0 %v847_v22 }
  0x91   :  { %321 = vmatmul.mubr.bf16.vlgmr.msra.gmra.mrb[0].mxu0 %v110_v25  ;;  %766 = vmatpush3.bf16.msra.mxu1 %v876_v39 }
  0x92   :  { %469 = vmatpush1.bf16.msra.mxu0 %v845_v24  ;;  %500 = vmatprep.mubr.bf16.mxu0 %v1081_v0 }
  0x93   :  { %470 = vmatprep.subr.bf16.mxu0 %v850_v26  ;;  %771 = vmatprep.subr.bf16.mxu1 %v1082_v1 }
  0x94   :  { %768 = vmatmul.mubr.bf16.vlgmr.msra.gmra.mrb[0].mxu1 %v110_v25  ;;  %v156_v25 = vrot.slane %v143_v59, %v155_v23 }
  0x95   :  { %772 = vmatpush3.bf16.msra.mxu1 %v877_v48  ;;  %787 = vmatprep.mubr.msk.bf16.mxu1 %vm1083_vm0, %v1082_v1 }
  0x96   :  { %471 = vmatpush1.bf16.msra.mxu0 %v848_v28  ;;  %773 = vmatprep.subr.bf16.mxu1 %v1082_v1 }
  0x97   :  { %472 = vmatprep.subr.bf16.mxu0 %v853_v29 }
  0x99   :  { %774 = vmatpush3.bf16.msra.mxu1 %v878_v49 }
  0x9a   :  { %473 = vmatpush1.bf16.msra.mxu0 %v851_v31  ;;  %775 = vmatprep.subr.bf16.mxu1 %v1082_v1 }
  0x9b   :  { %474 = vmatprep.subr.bf16.mxu0 %v856_v32 }
  0x9d   :  { %776 = vmatpush3.bf16.msra.mxu1 %v879_v50 }
  0x9e   :  { %475 = vmatpush1.bf16.msra.mxu0 %v854_v34  ;;  %777 = vmatprep.subr.bf16.mxu1 %v1082_v1 }
  0x9f   :  { %476 = vmatprep.subr.bf16.mxu0 %v859_v35 }
  0xa1   :  { %778 = vmatpush3.bf16.msra.mxu1 %v880_v51 }
  0xa2   :  { %477 = vmatpush1.bf16.msra.mxu0 %v857_v37  ;;  %779 = vmatprep.subr.bf16.mxu1 %v1082_v1 }
  0xa3   :  { %478 = vmatprep.subr.bf16.mxu0 %v862_v38 }
  0xa5   :  { %780 = vmatpush3.bf16.msra.mxu1 %v881_v52 }
  0xa6   :  { %479 = vmatpush1.bf16.msra.mxu0 %v860_v40  ;;  %781 = vmatprep.subr.bf16.mxu1 %v1082_v1 }
  0xa7   :  { %480 = vmatprep.subr.bf16.mxu0 %v865_v41 }
  0xa9   :  { %782 = vmatpush3.bf16.msra.mxu1 %v882_v53 }
  0xaa   :  { %481 = vmatpush1.bf16.msra.mxu0 %v863_v42  ;;  %783 = vmatprep.subr.bf16.mxu1 %v1082_v1 }
  0xab   :  { %482 = vmatprep.subr.bf16.mxu0 %v868_v43 }
  0xad   :  { %784 = vmatpush3.bf16.msra.mxu1 %v883_v54 }
  0xae   :  { %483 = vmatpush1.bf16.msra.mxu0 %v866_v44  ;;  %785 = vmatprep.subr.bf16.mxu1 %v1082_v1 }
  0xb1   :  { %501 = vmatmul.mubr.bf16.vlgmr.msra.gmra.mrb[0].mxu0 %v107_v47  ;;  %786 = vmatpush3.bf16.msra.mxu1 %v884_v55 }
 0x184   :  { %v502_v61 = vpop.f32.mrb[0].mxu0 }
 0x185   :  { %v791_v62 = vadd.f32 %v502_v61, %v148_v60  ;;  %v504_v63 = vpop.f32.mrb[1].mxu0 }
 0x186   :  { %v506_v0 = vpop.f32.mrb[2].mxu0  ;;  %v792_v16 = vadd.f32 %v504_v63, %v152_v15 }
 0x187   :  { %v721_v2 = vmul.f32 -1.442695, %v791_v62  ;;  %v793_v3 = vadd.f32 %v506_v0, %v148_v60  ;;  %v508_v4 = vpop.f32.mrb[3].mxu0 }
 0x188   :  { %v794_v17 = vadd.f32 %v508_v4, %v152_v15  ;;  %v723_v18 = vmul.f32 -1.442695, %v792_v16 }
 0x189   :  { %885 = vpow2.f32 %v721_v2  ;;  %v722_v5 = vmul.f32 -1.442695, %v793_v3 }
 0x18a   :  { %v724_v19 = vmul.f32 -1.442695, %v794_v17 }
 0x18b   :  { %887 = vpow2.f32 %v722_v5 }
 0x193   :  { %v886_v6 = vpop.eup %885 }
 0x194   :  { %v519_v7 = vadd.f32 1.0, %v886_v6 }
 0x195   :  { %v888_v8 = vpop.eup %887 }
 0x196   :  { %889 = vrcp.f32 %v519_v7  ;;  %v520_v1 = vadd.f32 1.0, %v888_v8 }
 0x198   :  { %891 = vrcp.f32 %v520_v1 }
 0x199   :  { %893 = vpow2.f32 %v723_v18 }
 0x19a   :  { %895 = vpow2.f32 %v724_v19 }
 0x1a0   :  { %v890_v9 = vpop.eup %889 }
 0x1a1   :  { %v539_v11 = vmul.f32 %v890_v9, %v1224_v45 }
 0x1a2   :  { %v892_v10 = vpop.eup %891 }
 0x1a3   :  { %v540_v12 = vmul.f32 %v892_v10, %v1226_v46  ;;  %v894_v20 = vpop.eup %893 }
 0x1a4   :  { %v896_v21 = vpop.eup %895  ;;  %v533_v22 = vadd.f32 1.0, %v894_v20 }
 0x1a5   :  { %v541_v13 = vpack.c.bf16 %v540_v12, %v539_v11  ;;  %v534_v24 = vadd.f32 1.0, %v896_v21 }
 0x1a6   :  { %897 = vrcp.f32 %v533_v22 }
 0x1a7   :  { %788 = vmatmul.mubr.bf16.vlgmr.msra.gmra.mrb[0].mxu1 %v541_v13  ;;  %899 = vrcp.f32 %v534_v24 }
 0x1b0   :  { %v898_v32 = vpop.eup %897 }
 0x1b1   :  { %v900_v33 = vpop.eup %899  ;;  %v651_v34 = vsub.f32 1.0, %v898_v32 }
 0x1b2   :  { %v652_v35 = vsub.f32 1.0, %v900_v33 }
 0x1b3   :  { %v653_v37 = vmul.f32 %v651_v34, %v1224_v45 }
 0x1b4   :  { %v654_v40 = vmul.f32 %v652_v35, %v1226_v46 }
 0x27a   :  { %v640_v26 = vpop.f32.mrb[0].mxu1 }
 0x27b   :  { %v795_v27 = vadd.f32 %v640_v26, %v156_v25  ;;  %v789_v28 = vpop.f32.mrb[1].mxu1 }
 0x27c   :  { %v643_v29 = vpop.f32.mrb[2].mxu1 }
 0x27d   :  { %901 = vtanh.f32 %v795_v27  ;;  %v796_v30 = vadd.f32 %v643_v29, %v156_v25  ;;  %v790_v31 = vpop.f32.mrb[3].mxu1 }
 0x27f   :  { %903 = vtanh.f32 %v796_v30 }
 0x287   :  { %v902_v36 = vpop.eup %901 }
 0x288   :  { %v655_v38 = vmul.f32 %v902_v36, %v898_v32 }
 0x289   :  { %v904_v39 = vpop.eup %903 }
 0x28a   :  { %v656_v41 = vmul.f32 %v904_v39, %v900_v33  ;;  %v657_v42 = vadd.f32 %v655_v38, %v653_v37 }
 0x28c   :  { %v658_v43 = vadd.f32 %v656_v41, %v654_v40  ;;  %659 = vst [vmem:[#allocation13] sm:$0xff] %v657_v42 }
 0x28e   :  { %660 = vst [vmem:[#allocation13 + $0x8] sm:$0xff] %v658_v43 }
 0x28f   :  { %1048 = shalt.err (!%p1045_p10)
}
 0x290   :  { %s1049_s29 = scalar_lea.hbm %s1264_s6, 256 }
 0x291   :  { %p1050_p11 = scmp.ne.s32.totalorder %s1264_s6, %s1049_s29  ;;  %p1053_p12 = scmp.lt.u32.totalorder %s1049_s29, %s1264_s6 }
 0x293   :  { %p1055_p13 = pnand %p1053_p12, %p1050_p11 }
 0x295   :  { %1058 = shalt.err (!%p1055_p13)
}
 0x296   :  { %672 = dma.vmem_to_hbm [thread:$0]  %s667_s23, 256, %s1264_s6, [#allocation4], %s1071_s9, %s1071_s9, %s1072_s10  }
 0x297   :  { %1067 = dma.done.wait [#allocation4], 256  }
 0x298   :  { %1068 = vsyncadd [#allocation4], 4294967040 }
 0x299   :  { %676 = vsyncpa [#allocation3], 1 }
 0x29a   :  { %677 = vsyncpa [#allocation6], 1 }
 0x29b   :  { %678 = vsyncpa [#allocation9], 1 }
 0x29c   :  { %679 = vsyncpa [#allocation12], 1 }
 0x29d   :  { %680 = vsyncpa [#allocation4], 1 }

</bundles_post_ra>
